<compile_context>
chip_gen: v7x
topology: tpu7x:2x2x1
jax: 0.10.0
libtpu: 0.0.40
codegen_flags: <defaults>
</compile_context>

<pallas_src>
import math

import jax
import jax.numpy as jnp
import numpy as np
from jax.experimental import pallas as pl
from jax.experimental.pallas import tpu as pltpu

B = 4        # graphs per pallas_call (grid axis)
N = 16       # nodes per graph
IN = 32      # in_dim
H = 4        # num_heads
D = 8        # out_dim per head
HP = 8       # heads padded to the 8-sublane tile so all value slices stay tile-aligned
SLOPE = 0.01  # F.leaky_relu default negative slope


def gat_kernel(feat_ref, featT_ref, adj_ref, wz_ref, wat_ref, out_ref):
    x = feat_ref[0]        # (N, IN)
    xT = featT_ref[0]      # (IN, N)   wrapper-transposed
    adj_ds = adj_ref[0]    # (N, N)    adj_ds[dst, src] > 0  <=>  edge src -> dst

    # All per-head fc projections in one MXU matmul (head-major output columns).
    z = jnp.dot(x, wz_ref[...], preferred_element_type=jnp.float32)       # (N, H*D)

    # Both attention projections (src term `el`, dst term `er`) for all heads in one
    # matmul, produced directly in (head, node) layout -> no in-kernel transposes.
    elr = jnp.dot(wat_ref[...], xT, preferred_element_type=jnp.float32)   # (2*HP, N)
    elT = elr[:HP]         # (HP, N)  el[h, src]; rows >= H are zero padding
    erT = elr[HP:]         # (HP, N)  er[h, dst]

    # Stacked-head edge scores: s[h, dst, src] = LeakyReLU(el[h, src] + er[h, dst])
    s = erT[:, :, None] + elT[:, None, :]                                  # (HP, N, N)
    s = jnp.where(s >= 0.0, s, SLOPE * s)
    mask = (adj_ds > 0.0)[None, :, :]
    s = jnp.where(mask, s, -1e30)

    # Edge softmax over incoming edges (per dst row), all heads at once.
    m = jnp.max(s, axis=-1, keepdims=True)
    p = jnp.where(mask, jnp.exp(s - m), 0.0)
    # NOTE: a zero-in-degree node gets alpha = 0 -> output row 0 (DGL's update_all would
    # simply leave such a node unreduced); the test adds self-loops so it never triggers.
    denom = jnp.maximum(jnp.sum(p, axis=-1, keepdims=True), 1e-30)
    alpha = p * pl.reciprocal(denom, approx=True)                          # (HP, N, N)

    # One stacked aggregation matmul; cross-head blocks are discarded by a static
    # head-block select (cheaper than H tiny per-head matmuls + lane concatenate).
    agg = jnp.dot(alpha.reshape(HP * N, N), z,
                  preferred_element_type=jnp.float32).reshape(HP, N, H * D)
    head = jax.lax.broadcasted_iota(jnp.int32, (HP, 1, H * D), 0)
    col = jax.lax.broadcasted_iota(jnp.int32, (HP, 1, H * D), 2)
    sel = (col >= head * D) & (col < (head + 1) * D)                       # (HP, 1, H*D)
    out_ref[0] = jnp.sum(jnp.where(sel, agg, 0.0), axis=0)                 # (N, H*D)


def fuse_params(fc_w, attn_w):
    """fc_w: (H, D, IN) per-head nn.Linear weights; attn_w: (H, 2*D) per-head attn_fc."""
    # z = x @ w_z with head-major output columns (== torch.cat(head_outs, dim=1) layout)
    w_z = jnp.transpose(fc_w, (2, 0, 1)).reshape(IN, H * D)
    # el = z_h . a_src_h = x @ (W_h.T @ a_src_h): fold the attn vector into the fc weight.
    w_elT = jnp.einsum("hd,hdi->hi", attn_w[:, :D], fc_w)   # (H, IN)
    w_erT = jnp.einsum("hd,hdi->hi", attn_w[:, D:], fc_w)   # (H, IN)
    w_attnT = jnp.zeros((2 * HP, IN), jnp.float32)
    w_attnT = w_attnT.at[:H].set(w_elT).at[HP:HP + H].set(w_erT)
    return w_z, w_attnT


def gat_forward(feat, adj, w_z, w_attnT):
    """feat: (B, N, IN); adj: (B, src, dst) dense adjacency; returns (B, N, H*D)."""
    featT = jnp.transpose(feat, (0, 2, 1))      # (B, IN, N)   free in XLA
    adj_ds = jnp.transpose(adj, (0, 2, 1))      # (B, dst, src)
    return pl.pallas_call(
        gat_kernel,
        out_shape=jax.ShapeDtypeStruct((B, N, H * D), jnp.float32),
        grid=(B,),
        in_specs=[
            pl.BlockSpec((1, N, IN), lambda b: (b, 0, 0)),
            pl.BlockSpec((1, IN, N), lambda b: (b, 0, 0)),
            pl.BlockSpec((1, N, N), lambda b: (b, 0, 0)),
            pl.BlockSpec((IN, H * D), lambda b: (0, 0)),     # weights stay resident
            pl.BlockSpec((2 * HP, IN), lambda b: (0, 0)),
        ],
        out_specs=pl.BlockSpec((1, N, H * D), lambda b: (b, 0, 0)),
        compiler_params=pltpu.CompilerParams(
            dimension_semantics=("parallel",)),   # shards graphs across TCs on v7x
    )(feat, featT, adj_ds, w_z, w_attnT)


def gat_reference(feat, adj, fc_w, attn_w):
    """Pure-JAX reference mirroring the PyTorch module head-by-head (eval mode)."""
    hp = jax.lax.Precision.HIGHEST
    outs = []
    for b in range(feat.shape[0]):
        x = feat[b]
        mask = adj[b].T > 0.0                                   # (dst, src)
        head_outs = []
        for h in range(H):
            z = jnp.dot(x, fc_w[h].T, precision=hp)             # (N, D)
            el = jnp.dot(z, attn_w[h, :D], precision=hp)        # (N,) src term
            er = jnp.dot(z, attn_w[h, D:], precision=hp)        # (N,) dst term
            e = er[:, None] + el[None, :]                       # (dst, src)
            e = jnp.where(e >= 0.0, e, SLOPE * e)
            e = jnp.where(mask, e, -1e30)
            a = jax.nn.softmax(e, axis=-1)
            a = jnp.where(mask, a, 0.0)
            head_outs.append(jnp.dot(a, z, precision=hp))       # (N, D)
        outs.append(jnp.concatenate(head_outs, axis=1))         # merge='cat'
    return jnp.stack(outs)


if __name__ == "__main__":
    key = jax.random.PRNGKey(0)
    k_feat, k_adj, k_fc, k_attn = jax.random.split(key, 4)

    feat = jax.random.normal(k_feat, (B, N, IN), jnp.float32)
    # Deterministic random digraphs + self-loops so every node has >= 1 incoming edge.
    adj = (jax.random.uniform(k_adj, (B, N, N)) > 0.6).astype(jnp.float32)
    adj = jnp.maximum(adj, jnp.eye(N, dtype=jnp.float32)[None])

    # Per-head params mimicking nn.Linear default init U[-1/sqrt(fan_in), 1/sqrt(fan_in)].
    b_fc = 1.0 / math.sqrt(IN)
    fc_w = jax.random.uniform(k_fc, (H, D, IN), jnp.float32, -b_fc, b_fc)
    b_at = 1.0 / math.sqrt(2 * D)
    attn_w = jax.random.uniform(k_attn, (H, 2 * D), jnp.float32, -b_at, b_at)

    w_z, w_attnT = fuse_params(fc_w, attn_w)

    out = gat_forward(feat, adj, w_z, w_attnT)
    jax.block_until_ready(out)

    ref = gat_reference(feat, adj, fc_w, attn_w)
    np.testing.assert_allclose(np.asarray(out), np.asarray(ref), atol=2e-3, rtol=2e-3)
    print("KERNEL_OK")
</pallas_src>

<mosaic_0001>
module attributes {stable_mosaic.version = 11 : i64} {
  func.func @gat_kernel(%arg0: i32, %arg1: memref<1x16x32xf32, #tpu.memory_space<vmem>>, %arg2: memref<1x32x16xf32, #tpu.memory_space<vmem>>, %arg3: memref<1x16x16xf32, #tpu.memory_space<vmem>>, %arg4: memref<32x32xf32, #tpu.memory_space<vmem>>, %arg5: memref<16x32xf32, #tpu.memory_space<vmem>>, %arg6: memref<1x16x32xf32, #tpu.memory_space<vmem>>) attributes {dimension_semantics = [#tpu.dimension_semantics<parallel>], iteration_bounds = array<i64: 4>, scalar_prefetch = 0 : i64, scratch_operands = 0 : i64, tpu.core_type = #tpu.core_type<tc>, window_params = [{transform_indices = @transform_0, window_bounds = array<i64: 1, 16, 32>}, {transform_indices = @transform_1, window_bounds = array<i64: 1, 32, 16>}, {transform_indices = @transform_2, window_bounds = array<i64: 1, 16, 16>}, {pipeline_mode = #tpu.pipeline_mode<synchronous>, transform_indices = @transform_3, window_bounds = array<i64: 32, 32>}, {pipeline_mode = #tpu.pipeline_mode<synchronous>, transform_indices = @transform_4, window_bounds = array<i64: 16, 32>}, {transform_indices = @transform_5, window_bounds = array<i64: 1, 16, 32>}]} {
    %c0 = arith.constant 0 : index
    %c0_0 = arith.constant 0 : index
    %c0_1 = arith.constant 0 : index
    %0 = vector.load %arg1[%c0, %c0_0, %c0_1] : memref<1x16x32xf32, #tpu.memory_space<vmem>>, vector<1x16x32xf32>
    %1 = vector.shape_cast %0 : vector<1x16x32xf32> to vector<16x32xf32>
    %c0_2 = arith.constant 0 : index
    %c0_3 = arith.constant 0 : index
    %c0_4 = arith.constant 0 : index
    %2 = vector.load %arg2[%c0_2, %c0_3, %c0_4] : memref<1x32x16xf32, #tpu.memory_space<vmem>>, vector<1x32x16xf32>
    %3 = vector.shape_cast %2 : vector<1x32x16xf32> to vector<32x16xf32>
    %c0_5 = arith.constant 0 : index
    %c0_6 = arith.constant 0 : index
    %c0_7 = arith.constant 0 : index
    %4 = vector.load %arg3[%c0_5, %c0_6, %c0_7] : memref<1x16x16xf32, #tpu.memory_space<vmem>>, vector<1x16x16xf32>
    %5 = vector.shape_cast %4 : vector<1x16x16xf32> to vector<16x16xf32>
    %c0_8 = arith.constant 0 : index
    %c0_9 = arith.constant 0 : index
    %6 = vector.load %arg4[%c0_8, %c0_9] : memref<32x32xf32, #tpu.memory_space<vmem>>, vector<32x32xf32>
    %cst = arith.constant dense<0.000000e+00> : vector<16x32xf32>
    %7 = tpu.matmul %1, %6, %cst {dimension_numbers = #tpu.dot_dimension_numbers<[1], [0], [0], [1], [0, 0, 1, 1], [], []>} : vector<16x32xf32>, vector<32x32xf32>, vector<16x32xf32> -> vector<16x32xf32>
    %c0_10 = arith.constant 0 : index
    %c0_11 = arith.constant 0 : index
    %8 = vector.load %arg5[%c0_10, %c0_11] : memref<16x32xf32, #tpu.memory_space<vmem>>, vector<16x32xf32>
    %cst_12 = arith.constant dense<0.000000e+00> : vector<16x16xf32>
    %9 = tpu.matmul %8, %3, %cst_12 {dimension_numbers = #tpu.dot_dimension_numbers<[1], [0], [0], [1], [0, 0, 1, 1], [], []>} : vector<16x32xf32>, vector<32x16xf32>, vector<16x16xf32> -> vector<16x16xf32>
    %10 = vector.extract_strided_slice %9 {offsets = [0, 0], sizes = [8, 16], strides = [1, 1]} : vector<16x16xf32> to vector<8x16xf32>
    %11 = vector.extract_strided_slice %9 {offsets = [8, 0], sizes = [8, 16], strides = [1, 1]} : vector<16x16xf32> to vector<8x16xf32>
    %12 = vector.shape_cast %11 : vector<8x16xf32> to vector<8x16x1xf32>
    %13 = vector.shape_cast %10 : vector<8x16xf32> to vector<8x1x16xf32>
    %14 = vector.broadcast %12 : vector<8x16x1xf32> to vector<8x16x16xf32>
    %15 = vector.broadcast %13 : vector<8x1x16xf32> to vector<8x16x16xf32>
    %16 = arith.addf %14, %15 : vector<8x16x16xf32>
    %cst_13 = arith.constant 0.000000e+00 : f32
    %17 = vector.broadcast %cst_13 : f32 to vector<8x16x16xf32>
    %18 = arith.cmpf oge, %16, %17 : vector<8x16x16xf32>
    %cst_14 = arith.constant 0.00999999977 : f32
    %19 = vector.broadcast %cst_14 : f32 to vector<8x16x16xf32>
    %20 = arith.mulf %19, %16 : vector<8x16x16xf32>
    %21 = arith.select %18, %16, %20 : vector<8x16x16xi1>, vector<8x16x16xf32>
    %cst_15 = arith.constant 0.000000e+00 : f32
    %22 = vector.broadcast %cst_15 : f32 to vector<16x16xf32>
    %23 = arith.cmpf ogt, %5, %22 : vector<16x16xf32>
    %24 = vector.shape_cast %23 : vector<16x16xi1> to vector<1x16x16xi1>
    %cst_16 = arith.constant -1.000000e+30 : f32
    %25 = vector.shape_cast %24 : vector<1x16x16xi1> to vector<1x16x16xi1>
    %26 = vector.broadcast %25 : vector<1x16x16xi1> to vector<8x16x16xi1>
    %27 = vector.broadcast %cst_16 : f32 to vector<8x16x16xf32>
    %28 = arith.select %26, %21, %27 : vector<8x16x16xi1>, vector<8x16x16xf32>
    %cst_17 = arith.constant dense<0xFF800000> : vector<8x16xf32>
    %29 = vector.multi_reduction <maximumf>, %28, %cst_17 [2] : vector<8x16x16xf32> to vector<8x16xf32>
    %30 = vector.shape_cast %29 : vector<8x16xf32> to vector<8x16x1xf32>
    %31 = vector.broadcast %30 : vector<8x16x1xf32> to vector<8x16x16xf32>
    %32 = arith.subf %28, %31 : vector<8x16x16xf32>
    %33 = math.exp %32 : vector<8x16x16xf32>
    %cst_18 = arith.constant 0.000000e+00 : f32
    %34 = vector.shape_cast %24 : vector<1x16x16xi1> to vector<1x16x16xi1>
    %35 = vector.broadcast %34 : vector<1x16x16xi1> to vector<8x16x16xi1>
    %36 = vector.broadcast %cst_18 : f32 to vector<8x16x16xf32>
    %37 = arith.select %35, %33, %36 : vector<8x16x16xi1>, vector<8x16x16xf32>
    %cst_19 = arith.constant dense<0.000000e+00> : vector<8x16xf32>
    %38 = vector.multi_reduction <add>, %37, %cst_19 [2] : vector<8x16x16xf32> to vector<8x16xf32>
    %39 = vector.shape_cast %38 : vector<8x16xf32> to vector<8x16x1xf32>
    %cst_20 = arith.constant 1.000000e-30 : f32
    %40 = vector.broadcast %cst_20 : f32 to vector<8x16x1xf32>
    %41 = arith.maximumf %39, %40 : vector<8x16x1xf32>
    %42 = tpu.reciprocal %41 {approx = true} : vector<8x16x1xf32> -> vector<8x16x1xf32>
    %43 = vector.broadcast %42 : vector<8x16x1xf32> to vector<8x16x16xf32>
    %44 = arith.mulf %37, %43 : vector<8x16x16xf32>
    %45 = vector.shape_cast %44 : vector<8x16x16xf32> to vector<128x16xf32>
    %cst_21 = arith.constant dense<0.000000e+00> : vector<128x32xf32>
    %46 = tpu.matmul %45, %7, %cst_21 {dimension_numbers = #tpu.dot_dimension_numbers<[1], [0], [0], [1], [0, 0, 1, 1], [], []>} : vector<128x16xf32>, vector<16x32xf32>, vector<128x32xf32> -> vector<128x32xf32>
    %47 = vector.shape_cast %46 : vector<128x32xf32> to vector<8x16x32xf32>
    %48 = tpu.iota {dimensions = array<i32: 0>} : vector<8x1x32xi32>
    %49 = tpu.iota {dimensions = array<i32: 2>} : vector<8x1x32xi32>
    %c8_i32 = arith.constant 8 : i32
    %50 = vector.broadcast %c8_i32 : i32 to vector<8x1x32xi32>
    %51 = arith.muli %48, %50 : vector<8x1x32xi32>
    %52 = arith.cmpi sge, %49, %51 : vector<8x1x32xi32>
    %c1_i32 = arith.constant 1 : i32
    %53 = vector.broadcast %c1_i32 : i32 to vector<8x1x32xi32>
    %54 = arith.addi %48, %53 : vector<8x1x32xi32>
    %c8_i32_22 = arith.constant 8 : i32
    %55 = vector.broadcast %c8_i32_22 : i32 to vector<8x1x32xi32>
    %56 = arith.muli %54, %55 : vector<8x1x32xi32>
    %57 = arith.cmpi slt, %49, %56 : vector<8x1x32xi32>
    %58 = arith.andi %52, %57 : vector<8x1x32xi1>
    %cst_23 = arith.constant 0.000000e+00 : f32
    %59 = vector.shape_cast %58 : vector<8x1x32xi1> to vector<8x1x32xi1>
    %60 = vector.broadcast %59 : vector<8x1x32xi1> to vector<8x16x32xi1>
    %61 = vector.broadcast %cst_23 : f32 to vector<8x16x32xf32>
    %62 = arith.select %60, %47, %61 : vector<8x16x32xi1>, vector<8x16x32xf32>
    %cst_24 = arith.constant dense<0.000000e+00> : vector<16x32xf32>
    %63 = vector.multi_reduction <add>, %62, %cst_24 [0] : vector<8x16x32xf32> to vector<16x32xf32>
    %c0_25 = arith.constant 0 : index
    %c0_26 = arith.constant 0 : index
    %c0_27 = arith.constant 0 : index
    %64 = vector.load %arg6[%c0_25, %c0_26, %c0_27] : memref<1x16x32xf32, #tpu.memory_space<vmem>>, vector<1x16x32xf32>
    %65 = vector.shape_cast %64 : vector<1x16x32xf32> to vector<16x32xf32>
    %66 = vector.shape_cast %63 : vector<16x32xf32> to vector<1x16x32xf32>
    tpu.vector_store %arg6[%c0_25, %c0_26, %c0_27], %66 {strides = array<i32>} : memref<1x16x32xf32, #tpu.memory_space<vmem>>, vector<1x16x32xf32>,
    return
  }
  func.func @transform_0(%arg0: i32) -> (i32, i32, i32) {
    %c0_i32 = arith.constant 0 : i32
    %c0_i32_0 = arith.constant 0 : i32
    %c0_i32_1 = arith.constant 0 : i32
    return %arg0, %c0_i32, %c0_i32_0 : i32, i32, i32
  }
  func.func @transform_1(%arg0: i32) -> (i32, i32, i32) {
    %c0_i32 = arith.constant 0 : i32
    %c0_i32_0 = arith.constant 0 : i32
    %c0_i32_1 = arith.constant 0 : i32
    return %arg0, %c0_i32, %c0_i32_0 : i32, i32, i32
  }
  func.func @transform_2(%arg0: i32) -> (i32, i32, i32) {
    %c0_i32 = arith.constant 0 : i32
    %c0_i32_0 = arith.constant 0 : i32
    %c0_i32_1 = arith.constant 0 : i32
    return %arg0, %c0_i32, %c0_i32_0 : i32, i32, i32
  }
  func.func @transform_3(%arg0: i32) -> (i32, i32) {
    %c0_i32 = arith.constant 0 : i32
    %c0_i32_0 = arith.constant 0 : i32
    %c0_i32_1 = arith.constant 0 : i32
    return %c0_i32, %c0_i32_0 : i32, i32
  }
  func.func @transform_4(%arg0: i32) -> (i32, i32) {
    %c0_i32 = arith.constant 0 : i32
    %c0_i32_0 = arith.constant 0 : i32
    %c0_i32_1 = arith.constant 0 : i32
    return %c0_i32, %c0_i32_0 : i32, i32
  }
  func.func @transform_5(%arg0: i32) -> (i32, i32, i32) {
    %c0_i32 = arith.constant 0 : i32
    %c0_i32_0 = arith.constant 0 : i32
    %c0_i32_1 = arith.constant 0 : i32
    return %arg0, %c0_i32, %c0_i32_0 : i32, i32, i32
  }
}

</mosaic_0001>

<bundles_post_ra>
// kernel: tpu_custom_call.1
= control target key start
LH: loop header
LB: loop body
LE: loop exit
PB: predicated region body
PF: predicated region fallthrough
CT: control target
= control target key end

     0   :  { %10 = vsyncpa [#allocation3], 0  ;;  %s2120_s0 = inlined_call_operand.vmem [shape: f32[4,16,32], index: 0, kind: input, shape index: {}]   ;;  %s2121_s1 = inlined_call_operand.vmem [shape: f32[4,32,16], index: 1, kind: input, shape index: {}]   ;;  %s2122_s2 = inlined_call_operand.vmem [shape: f32[4,16,16], index: 2, kind: input, shape index: {}]   ;;  %s2123_s3 = inlined_call_operand.vmem [shape: f32[32,32], index: 3, kind: input, shape index: {}]   ;;  %s2124_s4 = inlined_call_operand.vmem [shape: f32[16,32], index: 4, kind: input, shape index: {}]   ;;  %s2125_s5 = inlined_call_operand.hbm [shape: f32[4,16,32], index: 5, kind: output, shape index: {}]  }
   0x1   :  { %12 = vsyncpa [#allocation3 + $0x1], 0  ;;  %s1642_s18 = smov 0   ;;  %s1644_s19 = smov 0  }
   0x2   :  { %s1646_s20 = smov 0   ;;  %s1648_s21 = smov 0  }
   0x3 LB: > { %s1663_s22 = sadd.s32 4294967295, %s1606_s21   ;;  %s1296_s23 = sadd.s32 4294967294, %s1606_s21   ;;  %s1606_s21 = sphi %s1648_s21, %s2137_s21   ;;  %s1602_s20 = sphi %s1646_s20, %s2136_s20   ;;  %s1598_s19 = sphi %s1644_s19, %s2135_s19   ;;  %s1594_s18 = sphi %s1642_s18, %s2134_s18  }
   0x4   : > { %s1667_s24 = sadd.s32 1, %s1606_s21   ;;  %s145_s25 = sadd.s32 1, %s1602_s20 }
   0x5   : > { %s142_s26 = ssub.s32 %s1606_s21, %s1667_s24  ;;  %p155_p0 = scmp.ne.s32.totalorder %s1602_s20, %s1598_s19 }
   0x6   : > { %p143_p1 = scmp.eq.s32.totalorder %s142_s26, 0  ;;  %p156_p2 = scmp.eq.s32.totalorder %s1663_s22, 3 }
   0x7   : > { %p161_p3 = scmp.ne.s32.totalorder %s1598_s19, %s1594_s18  ;;  %p162_p4 = scmp.eq.s32.totalorder %s1296_s23, 3 }
   0x8   : > { %s1678_s27 = scalar_select %p143_p1, %s1602_s20, %s145_s25  }
   0x9   : > { %p1680_p5 = por %p156_p2, %p155_p0  ;;  %p1684_p6 = por %p162_p4, %p161_p3 }
   0xa   : > { %p1299_p7 = scmp.ge.s32.totalorder %s1606_s21, 1  ;;  %p210_p8 = scmp.lt.s32.totalorder %s1606_s21, 5 }
   0xc   : > { %p211_p9 = pnand %p1299_p7, %p210_p8 }
   0xd   : > { %p248_p10 = scmp.lt.s32.totalorder (!%p211_p9), %s1663_s22, 3  ;;  %vm275_vm0 = vcmask (!%p211_p9), 261120   ;;  %v357_v0 = vld [vmem:[%s2124_s4] sm:$0xff] (!%p211_p9)  ;;  %v358_v7 = vld [vmem:[%s2124_s4 + $0x8] sm:$0xff] (!%p211_p9)  ;;  %v440_v8 = vlaneseq (!%p211_p9)  ;;  %v1608_v9 = vmov (!%p211_p9), 1966171168  }
   0xe   : > { %214 = sbr.rel (%p211_p9) target bundleno = 954 (0x3ba), region = 40  ;;  %1385 = vmatprep.mubr.msk.f32.mxu1 (!%p211_p9), %vm275_vm0, %v357_v0  ;;  %v531_v10 = vunpack.c.l.s4 (!%p211_p9), %v1608_v9  ;;  %v271_v53 = vld [vmem:[%s2123_s3] sm:$0xff] (!%p211_p9)  ;;  %v272_v54 = vld [vmem:[%s2123_s3 + $0x8] sm:$0xff] (!%p211_p9)  ;;  %v273_v55 = vld [vmem:[%s2123_s3 + $0x10] sm:$0xff] (!%p211_p9)  ;;  %vm704_vm4 = vcmask (!%p211_p9), 130048   ;;  %s245_s13 = sand.u32 (!%p211_p9), 1, %s1598_s19  }
   0xf   : > { %v441_v11 = vshrl.u32 (!%p211_p9), %v440_v8, 7  ;;  %v1416_v56 = vpack.c.bf16 (!%p211_p9), %v272_v54, %v271_v53  ;;  %v274_v57 = vld [vmem:[%s2123_s3 + $0x18] sm:$0xff] (!%p211_p9)  ;;  %s1335_s17 = sshll.u32 (!%p211_p9), %s1663_s22, 8  ;;  %s1609_s6 = smov (!%p211_p9), [#allocation2]  }
  0x10   : > { %v532_v12 = vunpack.c.0.s8 (!%p211_p9), %v531_v10  ;;  %v1420_v59 = vpack.c.bf16 (!%p211_p9), %v274_v57, %v273_v55  ;;  %s2071_s26 = scalar_lea.hbm (!%p211_p9), %s2125_s5, %s1335_s17 }
  0x11   : > { %v453_v13 = vsub.s32 (!%p211_p9), 1, %v441_v11  ;;  %v442_v14 = vsub.s32 (!%p211_p9), 0, %v441_v11  ;;  %v486_v25 = vsub.s32 (!%p211_p9), 4, %v441_v11  ;;  %v464_v26 = vsub.s32 (!%p211_p9), 2, %v441_v11  ;;  %1417 = vmatprep.subr.bf16.mxu0 (!%p211_p9), %v1416_v56 }
  0x12   : > { %v535_v15 = vsub.s32 (!%p211_p9), %v532_v12, %v441_v11  ;;  %v497_v45 = vsub.s32 (!%p211_p9), 5, %v441_v11  ;;  %v475_v46 = vsub.s32 (!%p211_p9), 3, %v441_v11  ;;  %v508_v49 = vsub.s32 (!%p211_p9), 6, %v441_v11  ;;  %1419 = vmatpush3.bf16.msra.mxu0 (!%p211_p9), %v1416_v56 }
  0x13   : > { %v519_v51 = vsub.s32 (!%p211_p9), 7, %v441_v11  ;;  %1421 = vmatprep.subr.bf16.mxu0 (!%p211_p9), %v1420_v59 }
  0x15   : > { %s1696_s7 = scalar_select %p248_p10, %s1663_s22, 3 }
  0x16   : > { %1423 = vmatpush3.bf16.msra.mxu0 %v1420_v59  ;;  %s2079_s22 = scalar_lea.sflag [#allocation3], %s245_s13 }
  0x17   : > { %s1333_s8 = sshll.u32 %s1696_s7, 5  ;;  %s1332_s14 = sshll.u32 %s1696_s7, 4 }
  0x18   : > { %s257_s11 = scalar_lea.vmem %s2121_s1, %s1333_s8  ;;  %s252_s8 = scalar_lea.vmem %s2120_s0, %s1332_s14 }
  0x19   : > { %v265_v1 = vld [vmem:[%s257_s11] sm:$0xff]  ;;  %v266_v2 = vld [vmem:[%s257_s11 + $0x8] sm:$0xff]  ;;  %v267_v4 = vld [vmem:[%s257_s11 + $0x10] sm:$0xff]  ;;  %s262_s12 = scalar_lea.vmem %s2122_s2, %s1332_s14  ;;  %s1300_s14 = sshll.u32 %s245_s13, 4 }
  0x1a   : > { %v1424_v3 = vpack.c.bf16 %v266_v2, %v265_v1  ;;  %v268_v5 = vld [vmem:[%s257_s11 + $0x18] sm:$0xff]  ;;  %v263_v58 = vld [vmem:[%s252_s8] sm:$0xff]  ;;  %v264_v60 = vld [vmem:[%s252_s8 + $0x8] sm:$0xff]  ;;  %s247_s15 = scalar_lea.vmem [#allocation2], %s1300_s14  ;;  %s1548_s8 = sshll.u32 %s1609_s6, 4  ;;  %s1549_s8 = int_to_ptr.vmem [resolvable:$false] %s1548_s8 }
  0x1b   : > { %v1428_v6 = vpack.c.bf16 %v268_v5, %v267_v4  ;;  %1374 = vmatprep.mubr.msk.f32.mxu0 %vm275_vm0, %v263_v58  ;;  %v1744_v61 = vld [vmem:[%s262_s12] sm:$0xff]  ;;  %v1748_v2 = vld [vmem:[%s262_s12 + $0x8] sm:$0xff]  ;;  %s1210_s16 = sshll.u32 %s247_s15, 4  ;;  %s1550_s9 = scalar_lea.vmem %s1549_s8, 512  ;;  %s2073_s16 = int_to_ptr.vmem [resolvable:$true] %s1210_s16 }
  0x1c   : > { %1425 = vmatprep.subr.bf16.mxu1 %v1424_v3  ;;  %1375 = vmatmul.mubr.msk.f32.vlgmr.msra.gmra.mrb[0].mxu0 %vm275_vm0, %v264_v60  ;;  %vm682_vm1 = vcmp.gt.f32.partialorder %v1744_v61, 0.0  ;;  %vm683_vm5 = vcmp.gt.f32.partialorder %v1748_v2, 0.0  ;;  %s1544_s30 = scalar_lea.vmem %s2073_s16, 256  ;;  %p1551_p0 = scmp.lt.s32.totalorder %s2073_s16, %s1549_s8 }
  0x1d   : > { %1427 = vmatpush3.bf16.msra.mxu1 %v1424_v3  ;;  %p1545_p11 = scmp.ne.s32.totalorder %s2073_s16, %s1544_s30  ;;  %p1552_p1 = scmp.lt.s32.totalorder %s1550_s9, %s1544_s30 }
  0x1e   : > { %1429 = vmatprep.subr.bf16.mxu1 %v1428_v6 }
  0x1f   : > { %p1546_p12 = pnand %p1545_p11, %p1680_p5  ;;  %p1553_p2 = por %p1552_p1, %p1551_p0 }
  0x21   : > { %1431 = vmatpush3.bf16.msra.mxu1 %v1428_v6  ;;  %p1547_p13 = pneg %p1546_p12 }
  0x23   : > { %p1554_p3 = pnand %p1553_p2, %p1547_p13 }
  0x24   : > { %1386 = vmatmul.mubr.msk.f32.vlgmr.msra.gmra.mrb[0].mxu1 %vm275_vm0, %v358_v7 }
  0xf7   : > { %v1387_v16 = vpop.f32.mrb[0].mxu1 }
  0xf8   : > { %v431_v17 = vpop.f32.mrb[1].mxu1  ;;  %v454_v18 = vrot.slane %v1387_v16, %v453_v13  ;;  %v443_v19 = vrot.slane %v1387_v16, %v442_v14  ;;  %v487_v36 = vrot.slane %v1387_v16, %v486_v25  ;;  %v465_v37 = vrot.slane %v1387_v16, %v464_v26 }
  0xf9   : > { %v529_v20 = vcombine.high %v431_v17, %v431_v17  ;;  %v536_v21 = vrot.slane %v431_v17, %v535_v15  ;;  %v498_v47 = vrot.slane %v1387_v16, %v497_v45  ;;  %v476_v48 = vrot.slane %v1387_v16, %v475_v46 }
  0xfa   : > { %456 = vbcast.lane.b32.xlu1 %v454_v18, 256  ;;  %445 = vbcast.lane.b32.xlu0 %v443_v19, 256  ;;  %v509_v50 = vrot.slane %v1387_v16, %v508_v49  ;;  %v520_v52 = vrot.slane %v1387_v16, %v519_v51 }
  0xfb   : > { %v543_v22 = vrot.slane %v529_v20, %v535_v15  ;;  %v544_v23 = vcombine.high %v536_v21, %v536_v21  ;;  %v552_v24 = vrot.slane %v536_v21, %v535_v15 }
  0xfd   : > { %v545_v27 = vcombine.high %v543_v22, %v543_v22  ;;  %v566_v28 = vrot.slane %v544_v23, %v535_v15  ;;  %v1707_v29 = vrot.slane %v552_v24, %v442_v14  ;;  %v559_v30 = vrot.slane %v543_v22, %v535_v15 }
  0xfe   : > { %460 = vbcast.lane.b32.xlu1 %v454_v18, 264  ;;  %449 = vbcast.lane.b32.xlu0 %v443_v19, 264  ;;  %v574_v31 = vcombine.high %v552_v24, %v552_v24 }
  0xff   : > { %v1709_v32 = vrot.slane %v566_v28, %v442_v14  ;;  %v1711_v33 = vrot.slane %v559_v30, %v442_v14  ;;  %v573_v34 = vrot.slane %v545_v27, %v535_v15  ;;  %v576_v35 = vcombine.high %v566_v28, %v566_v28 }
 0x100   : > { %v1713_v38 = vrot.slane %v574_v31, %v442_v14  ;;  %v575_v39 = vcombine.high %v559_v30, %v559_v30 }
 0x101   : > { %v1715_v40 = vrot.slane %v573_v34, %v442_v14  ;;  %v1717_v41 = vrot.slane %v576_v35, %v442_v14  ;;  %v577_v42 = vcombine.high %v573_v34, %v573_v34 }
 0x102   : > { %489 = vbcast.lane.b32.xlu1 %v487_v36, 256  ;;  %467 = vbcast.lane.b32.xlu0 %v465_v37, 256  ;;  %v1719_v43 = vrot.slane %v575_v39, %v442_v14 }
 0x103   : > { %v1721_v44 = vrot.slane %v577_v42, %v442_v14 }
 0x106   : > { %493 = vbcast.lane.b32.xlu1 %v487_v36, 264  ;;  %471 = vbcast.lane.b32.xlu0 %v465_v37, 264 }
 0x10a   : > { %500 = vbcast.lane.b32.xlu1 %v498_v47, 256  ;;  %478 = vbcast.lane.b32.xlu0 %v476_v48, 256 }
 0x10e   : > { %504 = vbcast.lane.b32.xlu1 %v498_v47, 264  ;;  %482 = vbcast.lane.b32.xlu0 %v476_v48, 264 }
 0x112   : > { %515 = vbcast.lane.b32.xlu1 %v509_v50, 264  ;;  %511 = vbcast.lane.b32.xlu0 %v509_v50, 256 }
 0x116   : > { %526 = vbcast.lane.b32.xlu1 %v520_v52, 264  ;;  %522 = vbcast.lane.b32.xlu0 %v520_v52, 256 }
 0x16c   : > { %v457_v62 = vpop.permute.xlu1 %456  ;;  %v446_v63 = vpop.permute.xlu0 %445 }
 0x16d   : > { %v620_v0 = vadd.f32 %v1709_v32, %v457_v62  ;;  %v618_v1 = vadd.f32 %v1707_v29, %v446_v63 }
 0x16f   : > { %v652_v3 = vmul.f32 0.01, %v620_v0  ;;  %v650_v4 = vmul.f32 0.01, %v618_v1  ;;  %vm634_vm2 = vcmp.ge.f32.partialorder %v618_v1, 0.0  ;;  %vm636_vm3 = vcmp.ge.f32.partialorder %v620_v0, 0.0 }
 0x170   : > { %v461_v5 = vpop.permute.xlu1 %460  ;;  %v450_v6 = vpop.permute.xlu0 %449 }
 0x171   : > { %v621_v7 = vadd.f32 %v1709_v32, %v461_v5  ;;  %v619_v9 = vadd.f32 %v1707_v29, %v450_v6  ;;  %v666_v10 = vsel %vm634_vm2, %v618_v1, %v650_v4  ;;  %v668_v11 = vsel %vm636_vm3, %v620_v0, %v652_v3 }
 0x172   : > { %v1756_v12 = vsel %vm682_vm1, %v666_v10, -1e+30  ;;  %v1760_v13 = vsel %vm682_vm1, %v668_v11, -1e+30 }
 0x173   : > { %v653_v14 = vmul.f32 0.01, %v621_v7  ;;  %v651_v15 = vmul.f32 0.01, %v619_v9  ;;  %v705_v16 = vsel %vm704_vm4, %v1756_v12, -inf  ;;  %vm635_vm6 = vcmp.ge.f32.partialorder %v619_v9, 0.0 }
 0x174   : > { %v490_v17 = vpop.permute.xlu1 %489  ;;  %v468_v18 = vpop.permute.xlu0 %467  ;;  %706 = vmax.xlane.f32.xlu0 %v705_v16  ;;  %vm637_vm7 = vcmp.ge.f32.partialorder %v621_v7, 0.0  ;;  %v711_v24 = vsel %vm704_vm4, %v1760_v13, -inf }
 0x175   : > { %v626_v19 = vadd.f32 %v1711_v33, %v490_v17  ;;  %v622_v20 = vadd.f32 %v1713_v38, %v468_v18  ;;  %v667_v21 = vsel %vm635_vm6, %v619_v9, %v651_v15  ;;  %v669_v22 = vsel %vm637_vm7, %v621_v7, %v653_v14 }
 0x176   : > { %v1768_v23 = vsel %vm683_vm5, %v667_v21, -1e+30  ;;  %v1774_v25 = vsel %vm683_vm5, %v669_v22, -1e+30 }
 0x177   : > { %v658_v26 = vmul.f32 0.01, %v626_v19  ;;  %v654_v27 = vmul.f32 0.01, %v622_v20  ;;  %v708_v28 = vsel %vm704_vm4, %v1768_v23, -inf  ;;  %vm638_vm8 = vcmp.ge.f32.partialorder %v622_v20, 0.0 }
 0x178   : > { %v494_v29 = vpop.permute.xlu1 %493  ;;  %v472_v30 = vpop.permute.xlu0 %471  ;;  %709 = vmax.xlane.f32.xlu1 %v708_v28  ;;  %712 = vmax.xlane.f32.xlu0 %v711_v24  ;;  %vm642_vm9 = vcmp.ge.f32.partialorder %v626_v19, 0.0  ;;  %v714_v37 = vsel %vm704_vm4, %v1774_v25, -inf }
 0x179   : > { %v627_v31 = vadd.f32 %v1711_v33, %v494_v29  ;;  %v623_v32 = vadd.f32 %v1713_v38, %v472_v30  ;;  %v670_v34 = vsel %vm638_vm8, %v622_v20, %v654_v27  ;;  %v674_v35 = vsel %vm642_vm9, %v626_v19, %v658_v26 }
 0x17a   : > { %v1782_v36 = vsel %vm682_vm1, %v670_v34, -1e+30  ;;  %v1788_v39 = vsel %vm682_vm1, %v674_v35, -1e+30 }
 0x17b   : > { %v659_v42 = vmul.f32 0.01, %v627_v31  ;;  %v655_v45 = vmul.f32 0.01, %v623_v32  ;;  %v717_v33 = vsel %vm704_vm4, %v1782_v36, -inf  ;;  %vm639_vm10 = vcmp.ge.f32.partialorder %v623_v32, 0.0 }
 0x17c   : > { %v501_v38 = vpop.permute.xlu1 %500  ;;  %v479_v46 = vpop.permute.xlu0 %478  ;;  %718 = vmax.xlane.f32.xlu1 %v717_v33  ;;  %715 = vmax.xlane.f32.xlu0 %v714_v37  ;;  %vm643_vm11 = vcmp.ge.f32.partialorder %v627_v31, 0.0  ;;  %v729_v52 = vsel %vm704_vm4, %v1788_v39, -inf }
 0x17d   : > { %v628_v47 = vadd.f32 %v1715_v40, %v501_v38  ;;  %v624_v48 = vadd.f32 %v1717_v41, %v479_v46  ;;  %v671_v49 = vsel %vm639_vm10, %v623_v32, %v655_v45  ;;  %v675_v50 = vsel %vm643_vm11, %v627_v31, %v659_v42 }
 0x17e   : > { %v1796_v51 = vsel %vm683_vm5, %v671_v49, -1e+30  ;;  %v1802_v53 = vsel %vm683_vm5, %v675_v50, -1e+30 }
 0x17f   : > { %v660_v54 = vmul.f32 0.01, %v628_v47  ;;  %v656_v55 = vmul.f32 0.01, %v624_v48  ;;  %v720_v56 = vsel %vm704_vm4, %v1796_v51, -inf  ;;  %vm640_vm12 = vcmp.ge.f32.partialorder %v624_v48, 0.0 }
 0x180   : > { %v505_v57 = vpop.permute.xlu1 %504  ;;  %v483_v58 = vpop.permute.xlu0 %482  ;;  %721 = vmax.xlane.f32.xlu1 %v720_v56  ;;  %730 = vmax.xlane.f32.xlu0 %v729_v52  ;;  %vm644_vm13 = vcmp.ge.f32.partialorder %v628_v47, 0.0  ;;  %v732_v1 = vsel %vm704_vm4, %v1802_v53, -inf }
 0x181   : > { %v629_v59 = vadd.f32 %v1715_v40, %v505_v57  ;;  %v625_v60 = vadd.f32 %v1717_v41, %v483_v58  ;;  %v672_v62 = vsel %vm640_vm12, %v624_v48, %v656_v55  ;;  %v676_v63 = vsel %vm644_vm13, %v628_v47, %v660_v54 }
 0x182   : > { %v1810_v0 = vsel %vm682_vm1, %v672_v62, -1e+30  ;;  %v1816_v3 = vsel %vm682_vm1, %v676_v63, -1e+30 }
 0x183   : > { %v661_v4 = vmul.f32 0.01, %v629_v59  ;;  %v657_v5 = vmul.f32 0.01, %v625_v60  ;;  %v723_v40 = vsel %vm704_vm4, %v1810_v0, -inf  ;;  %vm641_vm14 = vcmp.ge.f32.partialorder %v625_v60, 0.0 }
 0x184   : > { %v516_v41 = vpop.permute.xlu1 %515  ;;  %v512_v6 = vpop.permute.xlu0 %511  ;;  %724 = vmax.xlane.f32.xlu1 %v723_v40  ;;  %733 = vmax.xlane.f32.xlu0 %v732_v1  ;;  %vm645_vm15 = vcmp.ge.f32.partialorder %v629_v59, 0.0  ;;  %v735_v15 = vsel %vm704_vm4, %v1816_v3, -inf }
 0x185   : > { %v631_v7 = vadd.f32 %v1719_v43, %v516_v41  ;;  %v630_v9 = vadd.f32 %v1719_v43, %v512_v6  ;;  %v673_v10 = vsel %vm641_vm14, %v625_v60, %v657_v5  ;;  %v677_v11 = vsel %vm645_vm15, %v629_v59, %v661_v4 }
 0x186   : > { %v1824_v14 = vsel %vm683_vm5, %v673_v10, -1e+30  ;;  %v1830_v16 = vsel %vm683_vm5, %v677_v11, -1e+30 }
 0x187   : > { %v663_v17 = vmul.f32 0.01, %v631_v7  ;;  %v662_v18 = vmul.f32 0.01, %v630_v9  ;;  %v726_v19 = vsel %vm704_vm4, %v1824_v14, -inf  ;;  %vm646_vm2 = vcmp.ge.f32.partialorder %v630_v9, 0.0 }
 0x188   : > { %v527_v43 = vpop.permute.xlu1 %526  ;;  %v523_v20 = vpop.permute.xlu0 %522  ;;  %727 = vmax.xlane.f32.xlu1 %v726_v19  ;;  %736 = vmax.xlane.f32.xlu0 %v735_v15  ;;  %vm647_vm3 = vcmp.ge.f32.partialorder %v631_v7, 0.0  ;;  %v738_v28 = vsel %vm704_vm4, %v1830_v16, -inf }
 0x189   : > { %v633_v21 = vadd.f32 %v1721_v44, %v527_v43  ;;  %v632_v22 = vadd.f32 %v1721_v44, %v523_v20  ;;  %v678_v24 = vsel %vm646_vm2, %v630_v9, %v662_v18  ;;  %v679_v26 = vsel %vm647_vm3, %v631_v7, %v663_v17 }
 0x18a   : > { %v1838_v27 = vsel %vm682_vm1, %v678_v24, -1e+30  ;;  %v1846_v44 = vsel %vm683_vm5, %v679_v26, -1e+30 }
 0x18b   : > { %v665_v29 = vmul.f32 0.01, %v633_v21  ;;  %v664_v30 = vmul.f32 0.01, %v632_v22  ;;  %v741_v31 = vsel %vm704_vm4, %v1838_v27, -inf  ;;  %vm648_vm6 = vcmp.ge.f32.partialorder %v632_v22, 0.0 }
 0x18c   : > { %742 = vmax.xlane.f32.xlu1 %v741_v31  ;;  %739 = vmax.xlane.f32.xlu0 %v738_v28  ;;  %vm649_vm7 = vcmp.ge.f32.partialorder %v633_v21, 0.0  ;;  %v744_v42 = vsel %vm704_vm4, %v1846_v44, -inf }
 0x18d   : > { %v680_v32 = vsel %vm648_vm6, %v632_v22, %v664_v30  ;;  %v681_v34 = vsel %vm649_vm7, %v633_v21, %v665_v29 }
 0x18e   : > { %v1850_v35 = vsel %vm682_vm1, %v680_v32, -1e+30  ;;  %v1858_v45 = vsel %vm683_vm5, %v681_v34, -1e+30 }
 0x18f   : > { %v747_v37 = vsel %vm704_vm4, %v1850_v35, -inf  ;;  %v750_v33 = vsel %vm704_vm4, %v1858_v45, -inf }
 0x190   : > { %748 = vmax.xlane.f32.xlu1 %v747_v37  ;;  %745 = vmax.xlane.f32.xlu0 %v744_v42 }
 0x194   : > { %751 = vmax.xlane.f32.xlu0 %v750_v33 }
 0x201   : > { %v707_v38 = vpop.xlane.xlu0 %706 }
 0x202   : > { %v753_v46 = vsub.f32 %v1756_v12, %v707_v38 }
 0x204   : > { %v769_v47 = vmul.f32 1.442695, %v753_v46 }
 0x205   : > { %v710_v48 = vpop.xlane.xlu1 %709  ;;  %v713_v49 = vpop.xlane.xlu0 %712 }
 0x206   : > { %1480 = vpow2.f32 %v769_v47  ;;  %v754_v50 = vsub.f32 %v1768_v23, %v710_v48  ;;  %v755_v52 = vsub.f32 %v1760_v13, %v713_v49 }
 0x208   : > { %v771_v54 = vmul.f32 1.442695, %v754_v50  ;;  %v773_v55 = vmul.f32 1.442695, %v755_v52 }
 0x209   : > { %v719_v56 = vpop.xlane.xlu1 %718  ;;  %v716_v57 = vpop.xlane.xlu0 %715 }
 0x20a   : > { %1482 = vpow2.f32 %v771_v54  ;;  %v757_v58 = vsub.f32 %v1782_v36, %v719_v56  ;;  %v756_v59 = vsub.f32 %v1774_v25, %v716_v57 }
 0x20b   : > { %1484 = vpow2.f32 %v773_v55 }
 0x20c   : > { %v777_v60 = vmul.f32 1.442695, %v757_v58  ;;  %v775_v12 = vmul.f32 1.442695, %v756_v59 }
 0x20d   : > { %v722_v62 = vpop.xlane.xlu1 %721  ;;  %v731_v63 = vpop.xlane.xlu0 %730 }
 0x20e   : > { %1486 = vpow2.f32 %v777_v60  ;;  %v758_v1 = vsub.f32 %v1796_v51, %v722_v62  ;;  %v761_v23 = vsub.f32 %v1788_v39, %v731_v63 }
 0x20f   : > { %1488 = vpow2.f32 %v775_v12 }
 0x210   : > { %v1481_v13 = vpop.eup %1480  ;;  %v779_v4 = vmul.f32 1.442695, %v758_v1  ;;  %v785_v5 = vmul.f32 1.442695, %v761_v23 }
 0x211   : > { %v725_v40 = vpop.xlane.xlu1 %724  ;;  %v734_v41 = vpop.xlane.xlu0 %733  ;;  %v1871_v36 = vsel %vm682_vm1, %v1481_v13, 0.0 }
 0x212   : > { %1490 = vpow2.f32 %v779_v4  ;;  %v759_v25 = vsub.f32 %v1810_v0, %v725_v40  ;;  %v762_v6 = vsub.f32 %v1802_v53, %v734_v41  ;;  %v817_v51 = vsel %vm704_vm4, %v1871_v36, 0.0 }
 0x213   : > { %1492 = vpow2.f32 %v785_v5  ;;  %818 = vadd.xlane.f32.xlu1 %v817_v51 }
 0x214   : > { %v1483_v39 = vpop.eup %1482  ;;  %v781_v7 = vmul.f32 1.442695, %v759_v25  ;;  %v787_v9 = vmul.f32 1.442695, %v762_v6 }
 0x215   : > { %v1485_v10 = vpop.eup %1484  ;;  %v728_v11 = vpop.xlane.xlu1 %727  ;;  %v1879_v17 = vsel %vm683_vm5, %v1483_v39, 0.0 }
 0x216   : > { %v737_v15 = vpop.xlane.xlu0 %736  ;;  %1494 = vpow2.f32 %v781_v7  ;;  %v760_v0 = vsub.f32 %v1824_v14, %v728_v11  ;;  %v820_v18 = vsel %vm704_vm4, %v1879_v17, 0.0  ;;  %v1887_v19 = vsel %vm682_vm1, %v1485_v10, 0.0 }
 0x217   : > { %v763_v53 = vsub.f32 %v1816_v3, %v737_v15  ;;  %1496 = vpow2.f32 %v787_v9  ;;  %821 = vadd.xlane.f32.xlu0 %v820_v18  ;;  %v823_v22 = vsel %vm704_vm4, %v1887_v19, 0.0  ;;  %v1376_v15 = vpop.f32.mrb[0].mxu0 }
 0x218   : > { %v1487_v43 = vpop.eup %1486  ;;  %v783_v20 = vmul.f32 1.442695, %v760_v0  ;;  %824 = vadd.xlane.f32.xlu1 %v823_v22 }
 0x219   : > { %v789_v21 = vmul.f32 1.442695, %v763_v53  ;;  %v1489_v24 = vpop.eup %1488  ;;  %v743_v14 = vpop.xlane.xlu1 %742  ;;  %v1893_v3 = vsel %vm682_vm1, %v1487_v43, 0.0 }
 0x21a   : > { %v740_v26 = vpop.xlane.xlu0 %739  ;;  %1498 = vpow2.f32 %v783_v20  ;;  %v765_v28 = vsub.f32 %v1838_v27, %v743_v14  ;;  %v829_v30 = vsel %vm704_vm4, %v1893_v3, 0.0  ;;  %v1901_v31 = vsel %vm683_vm5, %v1489_v24, 0.0  ;;  %v348_v53 = vpop.f32.mrb[1].mxu0 }
 0x21b   : > { %v764_v29 = vsub.f32 %v1830_v16, %v740_v26  ;;  %1500 = vpow2.f32 %v789_v21  ;;  %v826_v42 = vsel %vm704_vm4, %v1901_v31, 0.0  ;;  %v1432_v18 = vpack.c.bf16 %v1376_v15, %v348_v53 }
 0x21c   : > { %v1491_v32 = vpop.eup %1490  ;;  %v793_v34 = vmul.f32 1.442695, %v765_v28  ;;  %830 = vadd.xlane.f32.xlu1 %v829_v30  ;;  %827 = vadd.xlane.f32.xlu0 %v826_v42 }
 0x21d   : > { %v791_v37 = vmul.f32 1.442695, %v764_v29  ;;  %v1493_v33 = vpop.eup %1492  ;;  %v749_v27 = vpop.xlane.xlu1 %748  ;;  %v1907_v16 = vsel %vm683_vm5, %v1491_v32, 0.0  ;;  %1433 = vmatprep.subr.bf16.mxu0 %v1432_v18  ;;  %1436 = vmatprep.subr.bf16.mxu1 %v1432_v18 }
 0x21e   : > { %v746_v38 = vpop.xlane.xlu0 %745  ;;  %1502 = vpow2.f32 %v793_v34  ;;  %v767_v46 = vsub.f32 %v1850_v35, %v749_v27  ;;  %v832_v48 = vsel %vm704_vm4, %v1907_v16, 0.0  ;;  %v1915_v49 = vsel %vm682_vm1, %v1493_v33, 0.0  ;;  %1435 = vmatpush3.bf16.msra.mxu0 %v1432_v18  ;;  %1437 = vmatpush3.bf16.msra.mxu1 %v1432_v18 }
 0x21f   : > { %v766_v47 = vsub.f32 %v1846_v44, %v746_v38  ;;  %1504 = vpow2.f32 %v791_v37  ;;  %v841_v55 = vsel %vm704_vm4, %v1915_v49, 0.0 }
 0x220   : > { %v1495_v50 = vpop.eup %1494  ;;  %v797_v52 = vmul.f32 1.442695, %v767_v46  ;;  %833 = vadd.xlane.f32.xlu1 %v832_v48  ;;  %842 = vadd.xlane.f32.xlu0 %v841_v55 }
 0x221   : > { %v795_v54 = vmul.f32 1.442695, %v766_v47  ;;  %v1497_v56 = vpop.eup %1496  ;;  %v1921_v44 = vsel %vm682_vm1, %v1495_v50, 0.0 }
 0x222   : > { %v752_v35 = vpop.xlane.xlu0 %751  ;;  %1506 = vpow2.f32 %v797_v52  ;;  %v835_v58 = vsel %vm704_vm4, %v1921_v44, 0.0  ;;  %v1928_v59 = vsel %vm683_vm5, %v1497_v56, 0.0 }
 0x223   : > { %v768_v57 = vsub.f32 %v1858_v45, %v752_v35  ;;  %1508 = vpow2.f32 %v795_v54  ;;  %v844_v60 = vsel %vm704_vm4, %v1928_v59, 0.0 }
 0x224   : > { %v1499_v12 = vpop.eup %1498  ;;  %836 = vadd.xlane.f32.xlu1 %v835_v58  ;;  %845 = vadd.xlane.f32.xlu0 %v844_v60 }
 0x225   : > { %v799_v62 = vmul.f32 1.442695, %v768_v57  ;;  %v1501_v63 = vpop.eup %1500  ;;  %v1934_v1 = vsel %vm683_vm5, %v1499_v12, 0.0 }
 0x226   : > { %v838_v45 = vsel %vm704_vm4, %v1934_v1, 0.0  ;;  %v1940_v23 = vsel %vm682_vm1, %v1501_v63, 0.0 }
 0x227   : > { %1510 = vpow2.f32 %v799_v62  ;;  %v847_v13 = vsel %vm704_vm4, %v1940_v23, 0.0 }
 0x228   : > { %v1503_v4 = vpop.eup %1502  ;;  %839 = vadd.xlane.f32.xlu1 %v838_v45  ;;  %848 = vadd.xlane.f32.xlu0 %v847_v13 }
 0x229   : > { %v1505_v5 = vpop.eup %1504  ;;  %v1946_v40 = vsel %vm682_vm1, %v1503_v4, 0.0 }
 0x22a   : > { %v853_v41 = vsel %vm704_vm4, %v1946_v40, 0.0  ;;  %v1952_v25 = vsel %vm683_vm5, %v1505_v5, 0.0 }
 0x22b   : > { %v850_v6 = vsel %vm704_vm4, %v1952_v25, 0.0 }
 0x22c   : > { %v1507_v51 = vpop.eup %1506  ;;  %854 = vadd.xlane.f32.xlu1 %v853_v41  ;;  %851 = vadd.xlane.f32.xlu0 %v850_v6 }
 0x22d   : > { %v1509_v39 = vpop.eup %1508  ;;  %v1958_v7 = vsel %vm682_vm1, %v1507_v51, 0.0 }
 0x22e   : > { %v859_v9 = vsel %vm704_vm4, %v1958_v7, 0.0  ;;  %v1964_v10 = vsel %vm683_vm5, %v1509_v39, 0.0 }
 0x22f   : > { %v856_v11 = vsel %vm704_vm4, %v1964_v10, 0.0 }
 0x230   : > { %860 = vadd.xlane.f32.xlu1 %v859_v9  ;;  %857 = vadd.xlane.f32.xlu0 %v856_v11 }
 0x231   : > { %v1511_v0 = vpop.eup %1510 }
 0x232   : > { %v1970_v61 = vsel %vm683_vm5, %v1511_v0, 0.0 }
 0x233   : > { %v862_v43 = vsel %vm704_vm4, %v1970_v61, 0.0 }
 0x234   : > { %863 = vadd.xlane.f32.xlu0 %v862_v43 }
 0x2a0   : > { %v819_v20 = vpop.xlane.xlu1 %818 }
 0x2a1   : > { %v865_v21 = vmax.f32 %v819_v20, 1e-30 }
 0x2a3   : > { %1512 = vrcp.f32 %v865_v21 }
 0x2a4   : > { %v822_v22 = vpop.xlane.xlu0 %821 }
 0x2a5   : > { %v866_v24 = vmax.f32 %v822_v22, 1e-30  ;;  %v825_v14 = vpop.xlane.xlu1 %824 }
 0x2a6   : > { %v867_v26 = vmax.f32 %v825_v14, 1e-30 }
 0x2a7   : > { %1514 = vrcp.f32 %v866_v24 }
 0x2a8   : > { %1516 = vrcp.f32 %v867_v26 }
 0x2a9   : > { %v831_v2 = vpop.xlane.xlu1 %830  ;;  %v828_v28 = vpop.xlane.xlu0 %827 }
 0x2aa   : > { %v869_v29 = vmax.f32 %v831_v2, 1e-30  ;;  %v868_v30 = vmax.f32 %v828_v28, 1e-30 }
 0x2ac   : > { %1518 = vrcp.f32 %v869_v29 }
 0x2ad   : > { %v1513_v32 = vpop.eup %1512  ;;  %1520 = vrcp.f32 %v868_v30  ;;  %v834_v34 = vpop.xlane.xlu1 %833 }
 0x2ae   : > { %v843_v37 = vpop.xlane.xlu0 %842  ;;  %v897_v42 = vmul.f32 %v1513_v32, %v1871_v36  ;;  %v870_v33 = vmax.f32 %v834_v34, 1e-30 }
 0x2af   : > { %v873_v27 = vmax.f32 %v843_v37, 1e-30 }
 0x2b0   : > { %1392 = vmatprep.mubr.msk.f32.mxu0 %vm704_vm4, %v897_v42  ;;  %1522 = vrcp.f32 %v870_v33 }
 0x2b1   : > { %v1515_v38 = vpop.eup %1514  ;;  %1524 = vrcp.f32 %v873_v27  ;;  %v837_v46 = vpop.xlane.xlu1 %836 }
 0x2b2   : > { %v846_v47 = vpop.xlane.xlu0 %845  ;;  %v898_v48 = vmul.f32 %v1515_v38, %v1879_v17  ;;  %v1517_v50 = vpop.eup %1516  ;;  %v871_v52 = vmax.f32 %v837_v46, 1e-30 }
 0x2b3   : > { %v874_v54 = vmax.f32 %v846_v47, 1e-30  ;;  %v899_v55 = vmul.f32 %v1517_v50, %v1887_v19 }
 0x2b4   : > { %1393 = vmatmul.mubr.msk.f32.vlgmr.msra.gmra.mrb[2].mxu0 %vm704_vm4, %v898_v48  ;;  %1526 = vrcp.f32 %v871_v52 }
 0x2b5   : > { %1528 = vrcp.f32 %v874_v54  ;;  %v840_v36 = vpop.xlane.xlu1 %839  ;;  %1395 = vmatprep.mubr.msk.f32.mxu0 %vm704_vm4, %v899_v55 }
 0x2b6   : > { %v849_v56 = vpop.xlane.xlu0 %848  ;;  %v1519_v35 = vpop.eup %1518  ;;  %v872_v57 = vmax.f32 %v840_v36, 1e-30 }
 0x2b7   : > { %v875_v58 = vmax.f32 %v849_v56, 1e-30  ;;  %v1521_v60 = vpop.eup %1520  ;;  %v901_v12 = vmul.f32 %v1519_v35, %v1893_v3 }
 0x2b8   : > { %1530 = vrcp.f32 %v872_v57  ;;  %v900_v17 = vmul.f32 %v1521_v60, %v1901_v31 }
 0x2b9   : > { %1532 = vrcp.f32 %v875_v58  ;;  %v855_v62 = vpop.xlane.xlu1 %854 }
 0x2ba   : > { %v852_v63 = vpop.xlane.xlu0 %851  ;;  %v1523_v45 = vpop.eup %1522  ;;  %v877_v19 = vmax.f32 %v855_v62, 1e-30  ;;  %1396 = vmatmul.mubr.msk.f32.gmra.mrb[4].mxu0 %vm704_vm4, %v900_v17 }
 0x2bb   : > { %v876_v13 = vmax.f32 %v852_v63, 1e-30  ;;  %v1525_v4 = vpop.eup %1524  ;;  %1398 = vmatprep.mubr.msk.f32.mxu0 %vm704_vm4, %v901_v12  ;;  %v902_v5 = vmul.f32 %v1523_v45, %v1907_v16 }
 0x2bc   : > { %1534 = vrcp.f32 %v877_v19  ;;  %v905_v41 = vmul.f32 %v1525_v4, %v1915_v49 }
 0x2bd   : > { %1536 = vrcp.f32 %v876_v13  ;;  %v861_v3 = vpop.xlane.xlu1 %860 }
 0x2be   : > { %v858_v6 = vpop.xlane.xlu0 %857  ;;  %v1527_v31 = vpop.eup %1526  ;;  %v879_v51 = vmax.f32 %v861_v3, 1e-30  ;;  %1404 = vmatprep.mubr.msk.f32.mxu1 %vm704_vm4, %v905_v41  ;;  %1399 = vmatmul.mubr.msk.f32.gmra.mrb[6].mxu0 %vm704_vm4, %v902_v5 }
 0x2bf   : > { %v878_v39 = vmax.f32 %v858_v6, 1e-30  ;;  %v1529_v9 = vpop.eup %1528  ;;  %v903_v11 = vmul.f32 %v1527_v31, %v1921_v44 }
 0x2c0   : > { %1538 = vrcp.f32 %v879_v51  ;;  %v906_v15 = vmul.f32 %v1529_v9, %v1928_v59 }
 0x2c1   : > { %1540 = vrcp.f32 %v878_v39  ;;  %1401 = vmatprep.mubr.msk.f32.mxu0 %vm704_vm4, %v903_v11 }
 0x2c2   : > { %v864_v16 = vpop.xlane.xlu0 %863  ;;  %v1531_v49 = vpop.eup %1530  ;;  %1405 = vmatmul.mubr.msk.f32.vlgmr.msra.gmra.mrb[2].mxu1 %vm704_vm4, %v906_v15 }
 0x2c3   : > { %v880_v0 = vmax.f32 %v864_v16, 1e-30  ;;  %v1533_v53 = vpop.eup %1532  ;;  %v904_v18 = vmul.f32 %v1531_v49, %v1934_v1 }
 0x2c4   : > { %v907_v43 = vmul.f32 %v1533_v53, %v1940_v23 }
 0x2c5   : > { %1542 = vrcp.f32 %v880_v0  ;;  %1402 = vmatmul.mubr.msk.f32.gmra.mrb[8].mxu0 %vm704_vm4, %v904_v18 }
 0x2c6   : > { %v1535_v44 = vpop.eup %1534  ;;  %1407 = vmatprep.mubr.msk.f32.mxu1 %vm704_vm4, %v907_v43 }
 0x2c7   : > { %v1537_v59 = vpop.eup %1536  ;;  %v909_v20 = vmul.f32 %v1535_v44, %v1946_v40  ;;  %v2007_v40 = vand.u32 127, %v440_v8 }
 0x2c8   : > { %v908_v21 = vmul.f32 %v1537_v59, %v1952_v25 }
 0x2c9   : > { %vm1116_vm1 = vcmp.lt.s32.totalorder %v2007_v40, 8  ;;  %vm1109_vm5 = vcmp.ge.s32.totalorder %v2007_v40, 8  ;;  %vm1117_vm8 = vcmp.lt.s32.totalorder %v2007_v40, 16  ;;  %vm1110_vm10 = vcmp.ge.s32.totalorder %v2007_v40, 16 }
 0x2ca   : > { %v1539_v22 = vpop.eup %1538  ;;  %1408 = vmatmul.mubr.msk.f32.gmra.mrb[4].mxu1 %vm704_vm4, %v908_v21  ;;  %vm1125_vm9 = vmand %vm1109_vm5, %vm1117_vm8  ;;  %vm1118_vm11 = vcmp.lt.s32.totalorder %v2007_v40, 24  ;;  %vm1112_vm12 = vcmp.ge.s32.totalorder %v2007_v40, 32  ;;  %vm1120_vm13 = vcmp.lt.s32.totalorder %v2007_v40, 40  ;;  %vm1111_vm15 = vcmp.ge.s32.totalorder %v2007_v40, 24 }
 0x2cb   : > { %v1541_v24 = vpop.eup %1540  ;;  %1410 = vmatprep.mubr.msk.f32.mxu1 %vm704_vm4, %v909_v20  ;;  %v911_v1 = vmul.f32 %v1539_v22, %v1958_v7  ;;  %vm2029_vm14 = vmand %vm1112_vm12, %vm1120_vm13  ;;  %vm1119_vm2 = vcmp.lt.s32.totalorder %v2007_v40, 32  ;;  %vm1113_vm6 = vcmp.ge.s32.totalorder %v2007_v40, 40  ;;  %vm1121_vm7 = vcmp.lt.s32.totalorder %v2007_v40, 48 }
 0x2cc   : > { %v910_v23 = vmul.f32 %v1541_v24, %v1964_v10  ;;  %vm1127_vm3 = vmand %vm1111_vm15, %vm1119_vm2  ;;  %vm1114_vm5 = vcmp.ge.s32.totalorder %v2007_v40, 48  ;;  %vm1122_vm8 = vcmp.lt.s32.totalorder %v2007_v40, 56 }
 0x2ce   : > { %1411 = vmatmul.mubr.msk.f32.gmra.mrb[6].mxu1 %vm704_vm4, %v910_v23 }
 0x2cf   : > { %v1543_v14 = vpop.eup %1542  ;;  %1413 = vmatprep.mubr.msk.f32.mxu1 %vm704_vm4, %v911_v1 }
 0x2d0   : > { %v912_v26 = vmul.f32 %v1543_v14, %v1970_v61 }
 0x2d2   : > { %1414 = vmatmul.mubr.msk.f32.gmra.mrb[8].mxu1 %vm704_vm4, %v912_v26  ;;  %vm2016_vm4 = vmand %vm1110_vm10, %vm1118_vm11  ;;  %vm1115_vm10 = vcmp.ge.s32.totalorder %v2007_v40, 56  ;;  %vm1123_vm11 = vcmp.lt.s32.totalorder %v2007_v40, 64 }
 0x387   : > { %v1394_v25 = vpop.f32.mrb[2].mxu0 }
 0x388   : > { %v1149_v2 = vsel %vm1116_vm1, %v1394_v25, 0.0  ;;  %v1027_v28 = vpop.f32.mrb[3].mxu0 }
 0x389   : > { %v1148_v7 = vsel %vm1116_vm1, %v1027_v28, 0.0  ;;  %v1179_v8 = vsel %vm275_vm0, %v1149_v2, 0.0  ;;  %vm2044_vm1 = vmand %vm1113_vm6, %vm1121_vm7 }
 0x38a   : > { %v1164_v37 = vsel %vm275_vm0, %v1148_v7, 0.0 }
 0x38d   : > { %v1397_v10 = vpop.f32.mrb[4].mxu0 }
 0x38e   : > { %v1151_v61 = vsel %vm1125_vm9, %v1397_v10, 0.0  ;;  %v1037_v29 = vpop.f32.mrb[5].mxu0 }
 0x38f   : > { %v1180_v30 = vsel %vm275_vm0, %v1151_v61, 0.0  ;;  %v1150_v32 = vsel %vm1125_vm9, %v1037_v29, 0.0  ;;  %vm1130_vm9 = vmand %vm1114_vm5, %vm1122_vm8 }
 0x390   : > { %v1181_v42 = vadd.f32 %v1180_v30, %v1179_v8  ;;  %v1165_v33 = vsel %vm275_vm0, %v1150_v32, 0.0 }
 0x391   : > { %v1166_v27 = vadd.f32 %v1165_v33, %v1164_v37  ;;  %v1400_v38 = vpop.f32.mrb[6].mxu0 }
 0x392   : > { %v1153_v46 = vsel %vm2016_vm4, %v1400_v38, 0.0  ;;  %v1047_v47 = vpop.f32.mrb[7].mxu0 }
 0x393   : > { %v1182_v48 = vsel %vm275_vm0, %v1153_v46, 0.0  ;;  %v1152_v50 = vsel %vm2016_vm4, %v1047_v47, 0.0  ;;  %vm1131_vm4 = vmand %vm1115_vm10, %vm1123_vm11 }
 0x394   : > { %v1183_v54 = vadd.f32 %v1182_v48, %v1181_v42  ;;  %v1167_v55 = vsel %vm275_vm0, %v1152_v50, 0.0 }
 0x395   : > { %v1168_v36 = vadd.f32 %v1167_v55, %v1166_v27  ;;  %v1406_v56 = vpop.f32.mrb[2].mxu1 }
 0x396   : > { %v1157_v35 = vsel %vm2029_vm14, %v1406_v56, 0.0  ;;  %v1067_v57 = vpop.f32.mrb[3].mxu1 }
 0x397   : > { %v1156_v58 = vsel %vm2029_vm14, %v1067_v57, 0.0  ;;  %v1186_v4 = vsel %vm275_vm0, %v1157_v35, 0.0 }
 0x398   : > { %v1403_v60 = vpop.f32.mrb[8].mxu0  ;;  %v1171_v41 = vsel %vm275_vm0, %v1156_v58, 0.0 }
 0x399   : > { %v1155_v12 = vsel %vm1127_vm3, %v1403_v60, 0.0  ;;  %v1057_v17 = vpop.f32.mrb[9].mxu0 }
 0x39a   : > { %v1184_v62 = vsel %vm275_vm0, %v1155_v12, 0.0  ;;  %v1154_v63 = vsel %vm1127_vm3, %v1057_v17, 0.0 }
 0x39b   : > { %v1185_v45 = vadd.f32 %v1184_v62, %v1183_v54  ;;  %v1169_v19 = vsel %vm275_vm0, %v1154_v63, 0.0 }
 0x39c   : > { %v1170_v5 = vadd.f32 %v1169_v19, %v1168_v36 }
 0x39d   : > { %v1409_v3 = vpop.f32.mrb[4].mxu1  ;;  %v1187_v6 = vadd.f32 %v1186_v4, %v1185_v45 }
 0x39e   : > { %v1159_v31 = vsel %vm2044_vm1, %v1409_v3, 0.0  ;;  %v1077_v51 = vpop.f32.mrb[5].mxu1  ;;  %v1172_v39 = vadd.f32 %v1171_v41, %v1170_v5 }
 0x39f   : > { %v1188_v9 = vsel %vm275_vm0, %v1159_v31, 0.0  ;;  %v1158_v11 = vsel %vm2044_vm1, %v1077_v51, 0.0 }
 0x3a0   : > { %v1189_v15 = vadd.f32 %v1188_v9, %v1187_v6  ;;  %v1173_v16 = vsel %vm275_vm0, %v1158_v11, 0.0 }
 0x3a1   : > { %v1174_v49 = vadd.f32 %v1173_v16, %v1172_v39  ;;  %v1412_v0 = vpop.f32.mrb[6].mxu1 }
 0x3a2   : > { %v1161_v53 = vsel %vm1130_vm9, %v1412_v0, 0.0  ;;  %v1087_v18 = vpop.f32.mrb[7].mxu1 }
 0x3a3   : > { %v1190_v43 = vsel %vm275_vm0, %v1161_v53, 0.0  ;;  %v1160_v44 = vsel %vm1130_vm9, %v1087_v18, 0.0 }
 0x3a4   : > { %v1191_v59 = vadd.f32 %v1190_v43, %v1189_v15  ;;  %v1175_v20 = vsel %vm275_vm0, %v1160_v44, 0.0 }
 0x3a5   : > { %v1176_v21 = vadd.f32 %v1175_v20, %v1174_v49  ;;  %v1415_v22 = vpop.f32.mrb[8].mxu1 }
 0x3a6   : > { %v1163_v24 = vsel %vm1131_vm4, %v1415_v22, 0.0  ;;  %v1097_v1 = vpop.f32.mrb[9].mxu1 }
 0x3a7   : > { %v1192_v23 = vsel %vm275_vm0, %v1163_v24, 0.0  ;;  %v1162_v14 = vsel %vm1131_vm4, %v1097_v1, 0.0 }
 0x3a8   : > { %v1193_v26 = vadd.f32 %v1192_v23, %v1191_v59  ;;  %v1177_v40 = vsel %vm275_vm0, %v1162_v14, 0.0 }
 0x3a9   : > { %v1178_v25 = vadd.f32 %v1177_v40, %v1176_v21 }
 0x3aa   : > { %1195 = vst.msk [vmem:[%s247_s15 + $0x8] sm:$0xff] %vm275_vm0, %v1193_v26 }
 0x3ab   : > { %1194 = vst.msk [vmem:[%s247_s15] sm:$0xff] %vm275_vm0, %v1178_v25 }
 0x3ac   : > { %1557 = shalt.err (!%p1554_p3)
}
 0x3ad   : > { %s1558_s7 = scalar_lea.hbm %s2071_s26, 256  ;;  %s1562_s12 = scalar_lea.hbm %s2125_s5, 1024 }
 0x3ae   : > { %p1559_p4 = scmp.ne.s32.totalorder %s2071_s26, %s1558_s7  ;;  %p1563_p9 = scmp.lt.u32.totalorder %s2071_s26, %s2125_s5 }
 0x3af   : > { %p1564_p10 = scmp.lt.u32.totalorder %s1562_s12, %s1558_s7  ;;  %p1566_p12 = scmp.lt.u32.totalorder %s1558_s7, %s2071_s26 }
 0x3b0   : > { %p1560_p7 = pnand %p1559_p4, %p1680_p5 }
 0x3b1   : > { %p1565_p11 = por %p1564_p10, %p1563_p9 }
 0x3b2   : > { %p1561_p8 = pneg %p1560_p7 }
 0x3b3   : > { %p1567_p13 = por %p1566_p12, %p1565_p11 }
 0x3b5   : > { %p1568_p0 = pnand %p1567_p13, %p1561_p8 }
 0x3b7   : > { %1571 = shalt.err (!%p1568_p0)
}
 0x3b8   : > { %s1610_s15 = smov 128   ;;  %s1611_s17 = smov 8  }
 0x3b9   : > { %1438 = dma.vmem_to_hbm [thread:$0]  (%p1680_p5), %s2073_s16, 256, %s2071_s26, %s2079_s22, %s1610_s15, %s1610_s15, %s1611_s17  }
 0x3ba PF: > { %p1444_p1 = scmp.ge.s32.totalorder %s1606_s21, 2  ;;  %s1225_s23 = sand.u32 1, %s1594_s18  }
 0x3bb   : > { %s1226_s25 = scalar_lea.sflag [#allocation3], %s1225_s23 }
 0x3bc   : > { %p1441_p2 = pnand %p1444_p1, %p1684_p6 }
 0x3be   : > { %1589 = dma.done.wait (!%p1441_p2), %s1226_s25, 256  }
 0x3bf   : > { %1591 = vsyncadd (!%p1441_p2), %s1226_s25, 4294967040  ;;  %p15_p3 = scmp.ge.s32.totalorder %s1667_s24, 6   ;;  %s2134_s18 = smov %s1598_s19 }
 0x3c0   : > { %s2135_s19 = smov %s1602_s20  ;;  %s2136_s20 = smov %s1678_s27 }
 0x3c1   : > { %s2137_s21 = smov %s1667_s24  ;;  %17 = sbr.rel (!%p15_p3) target bundleno = 3 (0x3), region = 81 }
 0x3c8   :  { %1231 = vsyncpa [#allocation3], 1 }
 0x3c9   :  { %1233 = vsyncpa [#allocation3 + $0x1], 1 }

</bundles_post_ra>
